<compile_context>
chip_gen: v7x
topology: tpu7x:2x2x1
jax: 0.10.0
libtpu: 0.0.40
codegen_flags: <defaults>
</compile_context>

<pallas_src>
import functools

import jax
import jax.numpy as jnp
from jax.experimental import pallas as pl
from jax.experimental.pallas import tpu as pltpu


def _identity_dma_kernel(x_hbm, o_hbm, sems, *, chunk_rows, num_full, rem, ring):
    """Chunked HBM->HBM DMA copy along dim 0, with a `ring`-deep DMA pipeline.

    `num_full` chunks of `chunk_rows` rows each, plus an optional static-sized
    ragged tail of `rem` rows which is issued first (so it overlaps with the
    full-chunk stream) and waited last.
    """

    def full_copy(start_row, slot):
        return pltpu.make_async_copy(
            x_hbm.at[pl.ds(start_row, chunk_rows)],
            o_hbm.at[pl.ds(start_row, chunk_rows)],
            sems.at[slot],
        )

    def full_wait(slot):
        # Only the copy size and semaphore matter for a wait; offset 0 is fine.
        full_copy(0, slot).wait()

    tail = None
    if rem > 0:
        tail_start = num_full * chunk_rows
        tail = pltpu.make_async_copy(
            x_hbm.at[pl.ds(tail_start, rem)],
            o_hbm.at[pl.ds(tail_start, rem)],
            sems.at[ring],  # dedicated semaphore slot for the tail
        )
        tail.start()  # overlaps with the full-chunk stream below

    if num_full > 0:
        if num_full <= ring:
            # Few chunks: start them all (fully overlapped), then drain.
            for s in range(num_full):
                full_copy(s * chunk_rows, s % ring).start()
            for s in range(num_full):
                full_wait(s % ring)
        else:
            # K-deep semaphore ring: start chunk s, retire chunk s-ring.
            @pl.loop(0, num_full)
            def _issue(s):
                slot = s % ring

                @pl.when(s >= ring)
                def _retire():
                    full_wait(slot)

                start_row = pl.multiple_of(s * chunk_rows, chunk_rows)
                full_copy(start_row, slot).start()

            # Drain the last `ring` in-flight full-chunk DMAs.
            for j in range(ring):
                full_wait((num_full - ring + j) % ring)

    if rem > 0:
        tail.wait()


def identity_layer(x, *, tile_bytes=32 * 1024 * 1024, ring=4, donate=False):
    """Identity forward pass.

    donate=True returns x directly (zero HBM traffic -- the true optimum).
    Otherwise a distinct output buffer is materialized via a DMA-only Pallas
    copy kernel (HBM -> HBM, no VMEM staging, no compute).
    """
    if donate:
        return x

    orig_shape = x.shape
    dtype = x.dtype
    n = x.size
    if n == 0:
        return x
    itemsize = jnp.dtype(dtype).itemsize

    # Layout-preserving collapse: keep the last two dims intact, fold all
    # leading dims into a single chunking axis.  (A full 1-D flatten could
    # force a relayout copy under TPU (8,128)-tiled layouts.)
    if x.ndim >= 3:
        work = x.reshape((-1,) + x.shape[-2:])
    elif x.ndim == 0:
        work = x.reshape(1, 1)  # trivial 1-element case
    else:
        work = x  # 1-D / 2-D: chunk along dim 0 as-is

    num_rows = work.shape[0]
    row_bytes = (work.size // num_rows) * itemsize
    # ~tile_bytes per DMA; at least one row, at most the whole array.
    chunk_rows = min(num_rows, max(1, tile_bytes // row_bytes))
    num_full = num_rows // chunk_rows
    rem = num_rows - num_full * chunk_rows

    kernel = functools.partial(
        _identity_dma_kernel,
        chunk_rows=chunk_rows,
        num_full=num_full,
        rem=rem,
        ring=ring,
    )

    out = pl.pallas_call(
        kernel,
        out_shape=jax.ShapeDtypeStruct(work.shape, dtype),
        grid_spec=pltpu.PrefetchScalarGridSpec(
            num_scalar_prefetch=0,
            grid=(1,),  # all chunk DMAs issued from inside one body invocation
            in_specs=[pl.BlockSpec(memory_space=pl.ANY)],   # raw HBM ref
            out_specs=pl.BlockSpec(memory_space=pl.ANY),    # raw HBM ref
            scratch_shapes=[pltpu.SemaphoreType.DMA((ring + 1,))],  # ring + tail
        ),
        compiler_params=pltpu.CompilerParams(
            dimension_semantics=("arbitrary",),
        ),
        cost_estimate=pl.CostEstimate(
            flops=0,
            transcendentals=0,
            bytes_accessed=2 * n * itemsize,
        ),
    )(work)

    # Reshape back: last two dims unchanged => layout preserving.
    return out.reshape(orig_shape)


if __name__ == "__main__":
    key = jax.random.PRNGKey(0)

    # NCHW input consistent with a conv-style module: batch=2, channels=4, 16x16.
    x = jax.random.normal(key, (2, 4, 16, 16), dtype=jnp.float32)
    y = jax.block_until_ready(jax.jit(identity_layer)(x))
    assert y.shape == x.shape and y.dtype == x.dtype
    assert bool(jnp.all(y == x))

    # Exercise the deep-ring pipelined path + ragged tail: 11 rows of 8 KiB,
    # 2-row chunks -> 5 full chunks (> ring=4) + 1-row tail.
    x2 = jax.random.normal(key, (11, 16, 128), dtype=jnp.float32)
    small_tile_identity = jax.jit(
        functools.partial(identity_layer, tile_bytes=2 * 16 * 128 * 4)
    )
    y2 = jax.block_until_ready(small_tile_identity(x2))
    assert y2.shape == x2.shape and y2.dtype == x2.dtype
    assert bool(jnp.all(y2 == x2))

    # Donated / zero-copy path (true optimum for identity).
    y3 = identity_layer(x, donate=True)
    assert y3 is x

    print("KERNEL_OK")
</pallas_src>

<mosaic_0001>
module attributes {stable_mosaic.version = 11 : i64} {
  func.func @_identity_dma_kernel(%arg0: i32, %arg1: memref<8x16x16xf32, #tpu.memory_space<any>>, %arg2: memref<8x16x16xf32, #tpu.memory_space<any>>, %arg3: memref<5x!tpu.dma_semaphore, #tpu.memory_space<semaphore_mem>>) attributes {dimension_semantics = [#tpu.dimension_semantics<arbitrary>], iteration_bounds = array<i64: 1>, scalar_prefetch = 0 : i64, scratch_operands = 1 : i64, tpu.core_type = #tpu.core_type<tc>, window_params = [{}, {}]} {
    %c0_i32 = arith.constant 0 : i32
    %c0_i32_0 = arith.constant 0 : i32
    %c0_i32_1 = arith.constant 0 : i32
    %c0_i32_2 = arith.constant 0 : i32
    %0 = tpu.memref_slice %arg1[%c0_i32_0, %c0_i32_1, %c0_i32_2] : memref<8x16x16xf32, #tpu.memory_space<any>> -> memref<8x16x16xf32, #tpu.memory_space<any>>
    %c0_i32_3 = arith.constant 0 : i32
    %c0_i32_4 = arith.constant 0 : i32
    %c0_i32_5 = arith.constant 0 : i32
    %1 = tpu.memref_slice %arg2[%c0_i32_3, %c0_i32_4, %c0_i32_5] : memref<8x16x16xf32, #tpu.memory_space<any>> -> memref<8x16x16xf32, #tpu.memory_space<any>>
    %2 = tpu.memref_slice %arg3[%c0_i32] : memref<5x!tpu.dma_semaphore, #tpu.memory_space<semaphore_mem>> -> memref<1x!tpu.dma_semaphore, #tpu.memory_space<semaphore_mem>>
    %3 = tpu.memref_squeeze %2 : memref<1x!tpu.dma_semaphore, #tpu.memory_space<semaphore_mem>> -> memref<!tpu.dma_semaphore, #tpu.memory_space<semaphore_mem>>
    tpu.enqueue_dma source(%0 : memref<8x16x16xf32, #tpu.memory_space<any>>) target(%1 : memref<8x16x16xf32, #tpu.memory_space<any>>) target_semaphore(%3 : memref<!tpu.dma_semaphore, #tpu.memory_space<semaphore_mem>>)
    %c0_i32_6 = arith.constant 0 : i32
    %c0_i32_7 = arith.constant 0 : i32
    %c0_i32_8 = arith.constant 0 : i32
    %c0_i32_9 = arith.constant 0 : i32
    %4 = tpu.memref_slice %arg1[%c0_i32_7, %c0_i32_8, %c0_i32_9] : memref<8x16x16xf32, #tpu.memory_space<any>> -> memref<8x16x16xf32, #tpu.memory_space<any>>
    %c0_i32_10 = arith.constant 0 : i32
    %c0_i32_11 = arith.constant 0 : i32
    %c0_i32_12 = arith.constant 0 : i32
    %5 = tpu.memref_slice %arg2[%c0_i32_10, %c0_i32_11, %c0_i32_12] : memref<8x16x16xf32, #tpu.memory_space<any>> -> memref<8x16x16xf32, #tpu.memory_space<any>>
    %6 = tpu.memref_slice %arg3[%c0_i32_6] : memref<5x!tpu.dma_semaphore, #tpu.memory_space<semaphore_mem>> -> memref<1x!tpu.dma_semaphore, #tpu.memory_space<semaphore_mem>>
    %7 = tpu.memref_squeeze %6 : memref<1x!tpu.dma_semaphore, #tpu.memory_space<semaphore_mem>> -> memref<!tpu.dma_semaphore, #tpu.memory_space<semaphore_mem>>
    tpu.wait_dma2 semaphore(%7 : memref<!tpu.dma_semaphore, #tpu.memory_space<semaphore_mem>>) src(%4 : memref<8x16x16xf32, #tpu.memory_space<any>>) dst(%5 : memref<8x16x16xf32, #tpu.memory_space<any>>)
    return
  }
}

</mosaic_0001>

<bundles_post_ra>
// kernel: identity_layer.1
= control target key start
LH: loop header
LB: loop body
LE: loop exit
PB: predicated region body
PF: predicated region fallthrough
CT: control target
= control target key end

     0   :  { %s67_s6 = smov [#allocation2]   ;;  %s68_s7 = smov [#allocation3]   ;;  %s86_s0 = inlined_call_operand.hbm [shape: f32[8,16,16], index: 0, kind: input, shape index: {}]   ;;  %s87_s1 = inlined_call_operand.hbm [shape: f32[8,16,16], index: 1, kind: output, shape index: {}]  }
   0x1   :  { %s69_s8 = smov 0  }
   0x2   :  { %18 = dma.general %s86_s0, 2048, %s87_s1, %s67_s6, %s68_s7, [#allocation4], %s69_s8, 0  }
   0x3   :  { %65 = dma.done.wait [#allocation2], 2048 }
   0x4   :  { %66 = vsyncadd [#allocation2], 4294965248 }
   0x5   :  { %23 = vsyncmov [#allocation2] }
   0x8   :  { %s24_s13 = vpop.sfrf %23 }
   0x9   :  { %p57_p0 = scmp.ne.s32.totalorder %s24_s13, 0 }
   0xb   :  { %28 = shalt.err (%p57_p0)  }
   0xc   :  { %30 = vsyncmov [#allocation2 + $0x1] }
   0xf   :  { %s31_s14 = vpop.sfrf %30 }
  0x10   :  { %p58_p1 = scmp.ne.s32.totalorder %s31_s14, 0 }
  0x12   :  { %35 = shalt.err (%p58_p1)  }
  0x13   :  { %37 = vsyncmov [#allocation2 + $0x2] }
  0x16   :  { %s38_s15 = vpop.sfrf %37 }
  0x17   :  { %p59_p2 = scmp.ne.s32.totalorder %s38_s15, 0 }
  0x19   :  { %42 = shalt.err (%p59_p2)  }
  0x1a   :  { %44 = vsyncmov [#allocation2 + $0x3] }
  0x1d   :  { %s45_s16 = vpop.sfrf %44 }
  0x1e   :  { %p60_p3 = scmp.ne.s32.totalorder %s45_s16, 0 }
  0x20   :  { %49 = shalt.err (%p60_p3)  }
  0x21   :  { %51 = vsyncmov [#allocation2 + $0x4] }
  0x24   :  { %s52_s0 = vpop.sfrf %51 }
  0x25   :  { %p61_p4 = scmp.ne.s32.totalorder %s52_s0, 0 }
  0x27   :  { %56 = shalt.err (%p61_p4)  }

</bundles_post_ra>
